<compile_context>
chip_gen: v6e
topology: v6e:2x2x1
jax: 0.10.0
libtpu: 0.0.40
codegen_flags: <defaults>
</compile_context>

<pallas_src>
import functools

import jax
import jax.numpy as jnp
from jax import lax
from jax.experimental import pallas as pl
from jax.experimental.pallas import tpu as pltpu


# ----------------------------------------------------------------------------
# Kernels
# ----------------------------------------------------------------------------
def _lstm_step_kernel(x_ref, hid_ref, w_ref, b_ref, out_ref, *, hidden_size):
    """One LSTM step.

    x:(B,I) bf16, hid:(B,2H) f32 packed [h|c], w:(I+H,4H) bf16, b:(1,4H) f32,
    out:(B,2H) f32 packed [h_new|c_new].
    """
    H = hidden_size
    hid = hid_ref[...]                                            # (B, 2H) f32
    # Only the h half feeds the MXU (the fused weight has no rows for c).
    xh = jnp.concatenate([x_ref[...], hid[:, :H].astype(w_ref.dtype)], axis=-1)
    gates = jnp.dot(xh, w_ref[...], preferred_element_type=jnp.float32)
    gates = gates + b_ref[...]                                    # (1,4H) broadcast

    i_g = jax.nn.sigmoid(gates[:, 0 * H:1 * H])
    f_g = jax.nn.sigmoid(gates[:, 1 * H:2 * H])
    g_g = jnp.tanh(gates[:, 2 * H:3 * H])
    o_g = jax.nn.sigmoid(gates[:, 3 * H:4 * H])

    c_new = f_g * hid[:, H:] + i_g * g_g
    h_new = o_g * jnp.tanh(c_new)
    # Lane-aligned halves of the packed output; no concatenated temporary.
    out_ref[:, 0:H] = h_new.astype(out_ref.dtype)
    out_ref[:, H:2 * H] = c_new.astype(out_ref.dtype)


def _lstm_seq_kernel(x_ref, hid0_ref, w_ref, b_ref, out_ref, xh_ref, c_ref,
                     *, input_size, hidden_size, time_block):
    """Blocked time loop: Tb steps per grid iteration, weights VMEM-resident.

    x:(Tb,B,I) bf16, hid0:(B,2H) f32, w:(I+H,4H) bf16, b:(1,4H) f32,
    out:(Tb,B,2H) f32.  xh_ref:(B,I+H) bf16 persistent [x_t|h] slab,
    c_ref:(B,H) f32 persistent cell state.
    """
    I, H, Tb = input_size, hidden_size, time_block

    @pl.when(pl.program_id(0) == 0)
    def _():
        xh_ref[:, I:] = hid0_ref[:, :H].astype(xh_ref.dtype)
        c_ref[...] = hid0_ref[:, H:]

    def step(tb, carry):
        xh_ref[:, :I] = x_ref[tb]                                 # x_t already bf16
        gates = jnp.dot(xh_ref[...], w_ref[...],
                        preferred_element_type=jnp.float32)
        gates = gates + b_ref[...]

        i_g = jax.nn.sigmoid(gates[:, 0 * H:1 * H])
        f_g = jax.nn.sigmoid(gates[:, 1 * H:2 * H])
        g_g = jnp.tanh(gates[:, 2 * H:3 * H])
        o_g = jax.nn.sigmoid(gates[:, 3 * H:4 * H])

        c_new = f_g * c_ref[...] + i_g * g_g                      # f32 cell state
        h_new = o_g * jnp.tanh(c_new)

        c_ref[...] = c_new
        xh_ref[:, I:] = h_new.astype(xh_ref.dtype)                # h for next step
        out_ref[tb, :, 0:H] = h_new.astype(out_ref.dtype)
        out_ref[tb, :, H:2 * H] = c_new.astype(out_ref.dtype)
        return carry

    lax.fori_loop(0, Tb, step, None, unroll=True)


# ----------------------------------------------------------------------------
# pallas_call wrappers
# ----------------------------------------------------------------------------
def lstm_cell_step(x, hidden, w_cat, bias, *, hidden_size):
    """x:(B,I), hidden:(B,2H) f32, w_cat:(I+H,4H) bf16, bias:(1,4H) f32 -> (B,2H)."""
    B, I = x.shape
    H = hidden_size
    G = 4 * H
    K = I + H
    x = x.astype(w_cat.dtype)            # stream activations in bf16
    kernel = functools.partial(_lstm_step_kernel, hidden_size=H)
    return pl.pallas_call(
        kernel,
        out_shape=jax.ShapeDtypeStruct((B, 2 * H), hidden.dtype),
        grid_spec=pltpu.PrefetchScalarGridSpec(
            num_scalar_prefetch=0,
            grid=(1,),
            in_specs=[
                pl.BlockSpec((B, I), lambda i: (0, 0)),        # x (bf16)
                pl.BlockSpec((B, 2 * H), lambda i: (0, 0)),    # packed hidden (f32)
                pl.BlockSpec((K, G), lambda i: (0, 0)),        # fused weights (bf16)
                pl.BlockSpec((1, G), lambda i: (0, 0)),        # folded bias (f32)
            ],
            out_specs=pl.BlockSpec((B, 2 * H), lambda i: (0, 0)),
        ),
        # Packed state in -> packed state out (operand 1 is the hidden state;
        # same shape & dtype as the output so the buffer can be donated).
        input_output_aliases={1: 0},
        compiler_params=pltpu.CompilerParams(
            dimension_semantics=("arbitrary",)),
    )(x, hidden, w_cat, bias)


def lstm_sequence(x_seq, hidden0, w_cat, bias, *, hidden_size, time_block=8):
    """x_seq:(T,B,I), hidden0:(B,2H) f32 -> packed states (T,B,2H)."""
    T, B, I = x_seq.shape
    H = hidden_size
    G = 4 * H
    K = I + H
    Tb = min(time_block, T)
    assert T % Tb == 0, "sequence length must be a multiple of the time block"
    x_seq = x_seq.astype(w_cat.dtype)    # stream activations in bf16
    kernel = functools.partial(_lstm_seq_kernel, input_size=I, hidden_size=H,
                               time_block=Tb)
    return pl.pallas_call(
        kernel,
        out_shape=jax.ShapeDtypeStruct((T, B, 2 * H), hidden0.dtype),
        grid_spec=pltpu.PrefetchScalarGridSpec(
            num_scalar_prefetch=0,
            grid=(T // Tb,),
            in_specs=[
                pl.BlockSpec((Tb, B, I), lambda t: (t, 0, 0)),   # x block streamed
                pl.BlockSpec((B, 2 * H), lambda t: (0, 0)),      # initial state
                pl.BlockSpec((K, G), lambda t: (0, 0)),          # weights: resident
                pl.BlockSpec((1, G), lambda t: (0, 0)),          # bias: resident
            ],
            out_specs=pl.BlockSpec((Tb, B, 2 * H), lambda t: (t, 0, 0)),
            scratch_shapes=[
                pltpu.VMEM((B, K), w_cat.dtype),   # persistent [x_t | h] slab (bf16)
                pltpu.VMEM((B, H), jnp.float32),   # persistent f32 cell state
            ],
        ),
        compiler_params=pltpu.CompilerParams(
            dimension_semantics=("arbitrary",)),   # sequential recurrence
    )(x_seq, hidden0, w_cat, bias)


# ----------------------------------------------------------------------------
# Module wrapper
# ----------------------------------------------------------------------------
class CellWrapperPallas:
    """JAX/Pallas equivalent of CellWrapper(cell_class=nn.LSTMCell)."""
    # TODO(synk): ParameterizedModule scheduling/timing machinery (scheduled
    # values, forward_runtime stats) is Python-side bookkeeping with no kernel
    # equivalent and is not reproduced here.

    def __init__(self, input_size, hidden_size, key, param_dtype=jnp.bfloat16):
        assert hidden_size % 128 == 0, "H must be a multiple of 128 (lane width)"
        assert input_size % 128 == 0, "I must be a multiple of 128 (lane width)"
        self.input_size = input_size
        self.hidden_size = hidden_size
        H = hidden_size
        k1, k2, k3, k4 = jax.random.split(key, 4)
        bound = 1.0 / float(H) ** 0.5
        # PyTorch LSTMCell params: weight_ih (4H, I), weight_hh (4H, H), biases (4H,)
        w_ih = jax.random.uniform(k1, (4 * H, input_size), jnp.float32, -bound, bound)
        w_hh = jax.random.uniform(k2, (4 * H, H), jnp.float32, -bound, bound)
        b_ih = jax.random.uniform(k3, (4 * H,), jnp.float32, -bound, bound)
        b_hh = jax.random.uniform(k4, (4 * H,), jnp.float32, -bound, bound)
        # init_weights(): fill bias[n//4 : n//2] (forget gate) with 1.0
        n = 4 * H
        b_ih = b_ih.at[n // 4:n // 2].set(1.0)
        b_hh = b_hh.at[n // 4:n // 2].set(1.0)

        # Fused weight for a single MXU matmul over [x | h]:
        # W_cat = [W_ih^T ; W_hh^T], shape (I + H, 4H); the c half of the
        # packed state never feeds the matmul.  PyTorch gate order (i,f,g,o)
        # is preserved in the columns.
        w_cat = jnp.concatenate([jnp.transpose(w_ih), jnp.transpose(w_hh)], axis=0)
        self.w_cat = w_cat.astype(param_dtype)            # bf16 weights (HBM/MXU)
        self.bias = (b_ih + b_hh).reshape(1, 4 * H)       # folded biases, kept f32

        # state_component_sizes = [H, H]; packed state shape = (2H,)
        self.state_component_sizes = [H, H]
        self._initial_state = jnp.zeros((2 * H,), jnp.float32)  # train_initial_state=False

    def initial_state(self, batch_shape):
        if isinstance(batch_shape, int):
            batch_shape = (batch_shape,)
        batch_size = 1
        for b in batch_shape:
            batch_size *= b
        state = jnp.broadcast_to(self._initial_state[None, :],
                                 (batch_size,) + self._initial_state.shape)
        return state.reshape(*batch_shape, *self._initial_state.shape)

    def forward_packed(self, inp, hidden):
        """One step on packed state: (B, I), (B, 2H) -> (B, 2H)."""
        return lstm_cell_step(inp, hidden, self.w_cat, self.bias,
                              hidden_size=self.hidden_size)

    def forward(self, inp, hidden=None):
        """Matches CellWrapper.forward: returns the raw cell output (h, c)."""
        if hidden is None:
            hidden = self.initial_state(inp.shape[0])
        packed = self.forward_packed(inp, hidden)
        H = self.hidden_size
        return packed[..., :H], packed[..., H:]

    def forward_sequence(self, x_seq, hidden=None, *, time_block=8):
        """(T, B, I) -> (T, B, 2H) packed states; weights stay VMEM-resident."""
        if hidden is None:
            hidden = self.initial_state(x_seq.shape[1])
        return lstm_sequence(x_seq, hidden, self.w_cat, self.bias,
                             hidden_size=self.hidden_size, time_block=time_block)


# ----------------------------------------------------------------------------
# Pure-JAX reference
# ----------------------------------------------------------------------------
def _reference_step(x, h, c, w_cat_f32, bias, H, compute_dtype):
    xh = jnp.concatenate([x, h], axis=-1)
    xh = xh.astype(compute_dtype).astype(jnp.float32)   # mirror in-kernel bf16 cast
    gates = xh @ w_cat_f32 + bias
    i = jax.nn.sigmoid(gates[:, 0 * H:1 * H])
    f = jax.nn.sigmoid(gates[:, 1 * H:2 * H])
    g = jnp.tanh(gates[:, 2 * H:3 * H])
    o = jax.nn.sigmoid(gates[:, 3 * H:4 * H])
    c_new = f * c + i * g
    h_new = o * jnp.tanh(c_new)
    return h_new, c_new


if __name__ == "__main__":
    # Lane-aligned small shapes: H = 128 so H / 2H / 4H slabs are 128-multiples.
    B, I, H, T = 8, 128, 128, 16
    key = jax.random.PRNGKey(0)
    k_mod, k_x, k_h, k_seq = jax.random.split(key, 4)

    cell = CellWrapperPallas(I, H, k_mod)

    x = jax.random.normal(k_x, (B, I), jnp.float32)
    hidden = cell.initial_state(B)                      # packed zeros (B, 2H)
    hidden = hidden + 0.1 * jax.random.normal(k_h, hidden.shape, jnp.float32)

    w_f32 = cell.w_cat.astype(jnp.float32)              # what the MXU actually sees
    ref_h, ref_c = _reference_step(x, hidden[:, :H], hidden[:, H:],
                                   w_f32, cell.bias, H, cell.w_cat.dtype)

    # --- single step (matches CellWrapper.forward) ---
    h_new, c_new = cell.forward(x, hidden)
    jax.block_until_ready((h_new, c_new))
    assert jnp.allclose(h_new, ref_h, atol=1e-4, rtol=1e-4)
    assert jnp.allclose(c_new, ref_c, atol=1e-4, rtol=1e-4)

    # --- in-kernel blocked time loop: weights VMEM-resident, state in scratch ---
    x_seq = jax.random.normal(k_seq, (T, B, I), jnp.float32)
    out_seq = cell.forward_sequence(x_seq, hidden, time_block=8)   # (T, B, 2H)
    jax.block_until_ready(out_seq)

    def _scan_fn(carry, x_t):
        h, c = carry
        h2, c2 = _reference_step(x_t, h, c, w_f32, cell.bias, H, cell.w_cat.dtype)
        return (h2, c2), jnp.concatenate([h2, c2], axis=-1)

    _, ref_seq = jax.lax.scan(_scan_fn, (hidden[:, :H], hidden[:, H:]), x_seq)
    assert jnp.allclose(out_seq, ref_seq, atol=1e-3, rtol=1e-3)

    print("KERNEL_OK")
</pallas_src>

<mosaic_0001>
module attributes {stable_mosaic.version = 11 : i64} {
  func.func @_lstm_step_kernel(%arg0: i32, %arg1: memref<8x128xbf16, #tpu.memory_space<vmem>>, %arg2: memref<8x256xf32, #tpu.memory_space<vmem>>, %arg3: memref<256x512xbf16, #tpu.memory_space<vmem>>, %arg4: memref<1x512xf32, #tpu.memory_space<vmem>>, %arg5: memref<8x256xf32, #tpu.memory_space<vmem>>) attributes {dimension_semantics = [#tpu.dimension_semantics<arbitrary>], iteration_bounds = array<i64: 1>, scalar_prefetch = 0 : i64, scratch_operands = 0 : i64, tpu.core_type = #tpu.core_type<tc>, window_params = [{pipeline_mode = #tpu.pipeline_mode<synchronous>, transform_indices = @transform_0, window_bounds = array<i64: 8, 128>}, {pipeline_mode = #tpu.pipeline_mode<synchronous>, transform_indices = @transform_1, window_bounds = array<i64: 8, 256>}, {pipeline_mode = #tpu.pipeline_mode<synchronous>, transform_indices = @transform_2, window_bounds = array<i64: 256, 512>}, {pipeline_mode = #tpu.pipeline_mode<synchronous>, transform_indices = @transform_3, window_bounds = array<i64: 1, 512>}, {pipeline_mode = #tpu.pipeline_mode<synchronous>, transform_indices = @transform_4, window_bounds = array<i64: 8, 256>}]} {
    %c0 = arith.constant 0 : index
    %c0_0 = arith.constant 0 : index
    %0 = vector.load %arg2[%c0, %c0_0] : memref<8x256xf32, #tpu.memory_space<vmem>>, vector<8x256xf32>
    %c0_1 = arith.constant 0 : index
    %c0_2 = arith.constant 0 : index
    %1 = vector.load %arg1[%c0_1, %c0_2] : memref<8x128xbf16, #tpu.memory_space<vmem>>, vector<8x128xbf16>
    %2 = vector.extract_strided_slice %0 {offsets = [0, 0], sizes = [8, 128], strides = [1, 1]} : vector<8x256xf32> to vector<8x128xf32>
    %3 = arith.truncf %2 : vector<8x128xf32> to vector<8x128xbf16>
    %4 = tpu.concatenate %1, %3 in 1 : vector<8x128xbf16>, vector<8x128xbf16> -> vector<8x256xbf16>
    %c0_3 = arith.constant 0 : index
    %c0_4 = arith.constant 0 : index
    %5 = vector.load %arg3[%c0_3, %c0_4] : memref<256x512xbf16, #tpu.memory_space<vmem>>, vector<256x512xbf16>
    %cst = arith.constant dense<0.000000e+00> : vector<8x512xf32>
    %6 = tpu.matmul %4, %5, %cst {dimension_numbers = #tpu.dot_dimension_numbers<[1], [0], [0], [1], [0, 0, 1, 1], [], []>} : vector<8x256xbf16>, vector<256x512xbf16>, vector<8x512xf32> -> vector<8x512xf32>
    %c0_5 = arith.constant 0 : index
    %c0_6 = arith.constant 0 : index
    %7 = vector.load %arg4[%c0_5, %c0_6] : memref<1x512xf32, #tpu.memory_space<vmem>>, vector<1x512xf32>
    %8 = vector.broadcast %7 : vector<1x512xf32> to vector<8x512xf32>
    %9 = arith.addf %6, %8 : vector<8x512xf32>
    %10 = vector.extract_strided_slice %9 {offsets = [0, 0], sizes = [8, 128], strides = [1, 1]} : vector<8x512xf32> to vector<8x128xf32>
    %11 = arith.negf %10 : vector<8x128xf32>
    %12 = math.exp %11 : vector<8x128xf32>
    %cst_7 = arith.constant 1.000000e+00 : f32
    %13 = vector.broadcast %cst_7 : f32 to vector<8x128xf32>
    %14 = arith.addf %13, %12 : vector<8x128xf32>
    %15 = arith.divf %13, %14 : vector<8x128xf32>
    %16 = vector.extract_strided_slice %9 {offsets = [0, 128], sizes = [8, 128], strides = [1, 1]} : vector<8x512xf32> to vector<8x128xf32>
    %17 = arith.negf %16 : vector<8x128xf32>
    %18 = math.exp %17 : vector<8x128xf32>
    %cst_8 = arith.constant 1.000000e+00 : f32
    %19 = vector.broadcast %cst_8 : f32 to vector<8x128xf32>
    %20 = arith.addf %19, %18 : vector<8x128xf32>
    %21 = arith.divf %19, %20 : vector<8x128xf32>
    %22 = vector.extract_strided_slice %9 {offsets = [0, 256], sizes = [8, 128], strides = [1, 1]} : vector<8x512xf32> to vector<8x128xf32>
    %23 = math.tanh %22 : vector<8x128xf32>
    %24 = vector.extract_strided_slice %9 {offsets = [0, 384], sizes = [8, 128], strides = [1, 1]} : vector<8x512xf32> to vector<8x128xf32>
    %25 = arith.negf %24 : vector<8x128xf32>
    %26 = math.exp %25 : vector<8x128xf32>
    %cst_9 = arith.constant 1.000000e+00 : f32
    %27 = vector.broadcast %cst_9 : f32 to vector<8x128xf32>
    %28 = arith.addf %27, %26 : vector<8x128xf32>
    %29 = arith.divf %27, %28 : vector<8x128xf32>
    %30 = vector.extract_strided_slice %0 {offsets = [0, 128], sizes = [8, 128], strides = [1, 1]} : vector<8x256xf32> to vector<8x128xf32>
    %31 = arith.mulf %21, %30 : vector<8x128xf32>
    %32 = arith.mulf %15, %23 : vector<8x128xf32>
    %33 = arith.addf %31, %32 : vector<8x128xf32>
    %34 = math.tanh %33 : vector<8x128xf32>
    %35 = arith.mulf %29, %34 : vector<8x128xf32>
    %c0_10 = arith.constant 0 : index
    %c0_11 = arith.constant 0 : index
    %36 = vector.load %arg5[%c0_10, %c0_11] : memref<8x256xf32, #tpu.memory_space<vmem>>, vector<8x128xf32>
    tpu.vector_store %arg5[%c0_10, %c0_11], %35 {strides = array<i32>} : memref<8x256xf32, #tpu.memory_space<vmem>>, vector<8x128xf32>,
    %c0_12 = arith.constant 0 : index
    %c128 = arith.constant 128 : index
    %37 = vector.load %arg5[%c0_12, %c128] : memref<8x256xf32, #tpu.memory_space<vmem>>, vector<8x128xf32>
    tpu.vector_store %arg5[%c0_12, %c128], %33 {strides = array<i32>} : memref<8x256xf32, #tpu.memory_space<vmem>>, vector<8x128xf32>,
    return
  }
  func.func @transform_0(%arg0: i32) -> (i32, i32) {
    %c0_i32 = arith.constant 0 : i32
    %c0_i32_0 = arith.constant 0 : i32
    %c0_i32_1 = arith.constant 0 : i32
    return %c0_i32, %c0_i32_0 : i32, i32
  }
  func.func @transform_1(%arg0: i32) -> (i32, i32) {
    %c0_i32 = arith.constant 0 : i32
    %c0_i32_0 = arith.constant 0 : i32
    %c0_i32_1 = arith.constant 0 : i32
    return %c0_i32, %c0_i32_0 : i32, i32
  }
  func.func @transform_2(%arg0: i32) -> (i32, i32) {
    %c0_i32 = arith.constant 0 : i32
    %c0_i32_0 = arith.constant 0 : i32
    %c0_i32_1 = arith.constant 0 : i32
    return %c0_i32, %c0_i32_0 : i32, i32
  }
  func.func @transform_3(%arg0: i32) -> (i32, i32) {
    %c0_i32 = arith.constant 0 : i32
    %c0_i32_0 = arith.constant 0 : i32
    %c0_i32_1 = arith.constant 0 : i32
    return %c0_i32, %c0_i32_0 : i32, i32
  }
  func.func @transform_4(%arg0: i32) -> (i32, i32) {
    %c0_i32 = arith.constant 0 : i32
    %c0_i32_0 = arith.constant 0 : i32
    %c0_i32_1 = arith.constant 0 : i32
    return %c0_i32, %c0_i32_0 : i32, i32
  }
}

</mosaic_0001>

<bundles_post_ra>
// kernel: tpu_custom_call.1
= control target key start
LH: loop header
LB: loop body
LE: loop exit
PB: predicated region body
PF: predicated region fallthrough
CT: control target
= control target key end

     0   :  { %9 = vsyncpa [#allocation3], 0  ;;  %s873_s0 = inlined_call_operand.vmem [shape: bf16[8,128], index: 0, kind: input, shape index: {}]   ;;  %s874_s1 = inlined_call_operand.hbm [shape: f32[8,256], index: 1, kind: input, shape index: {}, may-alias: {1,4}]   ;;  %s875_s2 = inlined_call_operand.hbm [shape: bf16[256,512], index: 2, kind: input, shape index: {}]   ;;  %s876_s3 = inlined_call_operand.vmem [shape: f32[1,512], index: 3, kind: input, shape index: {}]   ;;  %s877_s4 = inlined_call_operand.hbm [shape: f32[8,256], index: 4, kind: output, shape index: {}, may-alias: {1,4}]  }
   0x1   :  { %10 = vsyncpa [#allocation6], 0 }
   0x2   :  { %11 = vsyncpa [#allocation4], 0  ;;  %s828_s15 = smov [#allocation2]   ;;  %s829_s17 = smov [#allocation5]  }
   0x3   :  { %s20_s16 = sshll.u32 %s828_s15, 4  ;;  %s29_s18 = sshll.u32 %s829_s17, 4  ;;  %s21_s16 = int_to_ptr.vmem [resolvable:$true] %s20_s16  ;;  %s30_s18 = int_to_ptr.vmem [resolvable:$true] %s29_s18 }
   0x4   :  { %s770_s19 = scalar_lea.vmem %s21_s16, 256  ;;  %p775_p1 = scmp.lt.s32.totalorder %s21_s16, %s21_s16 }
   0x5   :  { %p771_p0 = scmp.ne.s32.totalorder %s21_s16, %s770_s19  ;;  %p776_p2 = scmp.lt.s32.totalorder %s770_s19, %s770_s19 }
   0x7   :  { %p777_p3 = por %p776_p2, %p775_p1 }
   0x9   :  { %p778_p4 = pnand %p777_p3, %p771_p0 }
   0xb   :  { %781 = shalt.err (!%p778_p4)
}
   0xc   :  { %23 = dma.hbm_to_vmem [thread:$0]  %s874_s1, 256, %s21_s16, [#allocation3]  }
   0xd   :  { %s790_s22 = scalar_lea.vmem %s30_s18, 8192  ;;  %p795_p6 = scmp.lt.s32.totalorder %s30_s18, %s30_s18 }
   0xe   :  { %p791_p5 = scmp.ne.s32.totalorder %s30_s18, %s790_s22  ;;  %p796_p7 = scmp.lt.s32.totalorder %s790_s22, %s790_s22 }
  0x10   :  { %p797_p8 = por %p796_p7, %p795_p6 }
  0x12   :  { %p798_p9 = pnand %p797_p8, %p791_p5 }
  0x14   :  { %801 = shalt.err (!%p798_p9)
}
  0x15   :  { %s830_s23 = smov 256   ;;  %s831_s24 = smov 16  }
  0x16   :  { %35 = dma.hbm_to_vmem [thread:$0]  %s875_s2, 8192, %s30_s18, [#allocation6], %s830_s23, %s830_s23, %s831_s24  }
  0x17   :  { %822 = dma.done.wait [#allocation3], 256  }
  0x18   :  { %823 = vsyncadd [#allocation3], 4294967040 }
  0x19   :  { %824 = dma.done.wait [#allocation6], 8192  }
  0x1a   :  { %825 = vsyncadd [#allocation6], 4294959104  ;;  %v650_v0 = vld [vmem:[#allocation5 + $0xe4] ss:$16 sps:$4 sm:$0xff]   ;;  %v652_v1 = vld [vmem:[#allocation5 + $0xe0] ss:$16 sps:$4 sm:$0xff]  }
  0x1b   :  { %454 = vmatprep.subr.bf16.mxu0 %v650_v0  ;;  %v653_v2 = vld [vmem:[#allocation5 + $0xc4] ss:$16 sps:$4 sm:$0xff]   ;;  %v655_v3 = vld [vmem:[#allocation5 + $0xc0] ss:$16 sps:$4 sm:$0xff]   ;;  %v661_v5 = vld [vmem:[#allocation5 + $0xec] ss:$16 sps:$4 sm:$0xff]  }
  0x1c   :  { %455 = vmatpush1.bf16.msra.mxu0 %v652_v1  ;;  %v656_v4 = vld [vmem:[#allocation5 + $0xa4] ss:$16 sps:$4 sm:$0xff]   ;;  %v664_v6 = vld [vmem:[#allocation5 + $0xe8] ss:$16 sps:$4 sm:$0xff]   ;;  %v658_v7 = vld [vmem:[#allocation5 + $0xa0] ss:$16 sps:$4 sm:$0xff]   ;;  %495 = vmatprep.subr.bf16.mxu1 %v661_v5 }
  0x1d   :  { %456 = vmatprep.subr.bf16.mxu0 %v653_v2  ;;  %v659_v8 = vld [vmem:[#allocation5 + $0x84] ss:$16 sps:$4 sm:$0xff]   ;;  %496 = vmatpush1.bf16.msra.mxu1 %v664_v6  ;;  %v667_v9 = vld [vmem:[#allocation5 + $0xcc] ss:$16 sps:$4 sm:$0xff]   ;;  %v670_v10 = vld [vmem:[#allocation5 + $0xc8] ss:$16 sps:$4 sm:$0xff]  }
  0x1e   :  { %497 = vmatprep.subr.bf16.mxu1 %v667_v9  ;;  %v663_v11 = vld [vmem:[#allocation5 + $0x80] ss:$16 sps:$4 sm:$0xff]   ;;  %v665_v12 = vld [vmem:[#allocation5 + $0x64] ss:$16 sps:$4 sm:$0xff]   ;;  %v673_v13 = vld [vmem:[#allocation5 + $0xac] ss:$16 sps:$4 sm:$0xff]  }
  0x1f   :  { %v676_v14 = vld [vmem:[#allocation5 + $0xa8] ss:$16 sps:$4 sm:$0xff]   ;;  %v679_v15 = vld [vmem:[#allocation5 + $0x8c] ss:$16 sps:$4 sm:$0xff]   ;;  %v669_v16 = vld [vmem:[#allocation5 + $0x60] ss:$16 sps:$4 sm:$0xff]  }
  0x20   :  { %457 = vmatpush1.bf16.msra.mxu0 %v655_v3  ;;  %v671_v17 = vld [vmem:[#allocation5 + $0x44] ss:$16 sps:$4 sm:$0xff]   ;;  %v682_v18 = vld [vmem:[#allocation5 + $0x88] ss:$16 sps:$4 sm:$0xff]   ;;  %v685_v19 = vld [vmem:[#allocation5 + $0x6c] ss:$16 sps:$4 sm:$0xff]   ;;  %v114_v3 = vlaneseq }
  0x21   :  { %458 = vmatprep.subr.bf16.mxu0 %v656_v4  ;;  %498 = vmatpush1.bf16.msra.mxu1 %v670_v10  ;;  %v675_v20 = vld [vmem:[#allocation5 + $0x40] ss:$16 sps:$4 sm:$0xff]   ;;  %v677_v21 = vld [vmem:[#allocation5 + $0x24] ss:$16 sps:$4 sm:$0xff]   ;;  %v688_v22 = vld [vmem:[#allocation5 + $0x68] ss:$16 sps:$4 sm:$0xff]  }
  0x22   :  { %499 = vmatprep.subr.bf16.mxu1 %v673_v13  ;;  %v691_v23 = vld [vmem:[#allocation5 + $0x4c] ss:$16 sps:$4 sm:$0xff]   ;;  %v681_v24 = vld [vmem:[#allocation5 + $0x20] ss:$16 sps:$4 sm:$0xff]   ;;  %v683_v25 = vld [vmem:[#allocation5 + $0x4] ss:$16 sps:$4 sm:$0xff]  }
  0x23   :  { %v694_v26 = vld [vmem:[#allocation5 + $0x48] ss:$16 sps:$4 sm:$0xff]   ;;  %v697_v27 = vld [vmem:[#allocation5 + $0x2c] ss:$16 sps:$4 sm:$0xff]   ;;  %v687_v28 = vld [vmem:[#allocation5] ss:$16 sps:$4 sm:$0xff]  }
  0x24   :  { %459 = vmatpush1.bf16.msra.mxu0 %v658_v7  ;;  %v689_v29 = vld [vmem:[#allocation5 + $0x1e4] ss:$16 sps:$4 sm:$0xff]   ;;  %v700_v30 = vld [vmem:[#allocation5 + $0x28] ss:$16 sps:$4 sm:$0xff]   ;;  %v703_v31 = vld [vmem:[#allocation5 + $0xc] ss:$16 sps:$4 sm:$0xff]  }
  0x25   :  { %460 = vmatprep.subr.bf16.mxu0 %v659_v8  ;;  %500 = vmatpush1.bf16.msra.mxu1 %v676_v14  ;;  %v693_v32 = vld [vmem:[#allocation5 + $0x1e0] ss:$16 sps:$4 sm:$0xff]   ;;  %v695_v33 = vld [vmem:[#allocation5 + $0x1c4] ss:$16 sps:$4 sm:$0xff]   ;;  %v706_v34 = vld [vmem:[#allocation5 + $0x8] ss:$16 sps:$4 sm:$0xff]  }
  0x26   :  { %501 = vmatprep.subr.bf16.mxu1 %v679_v15  ;;  %v709_v35 = vld [vmem:[#allocation5 + $0x1ec] ss:$16 sps:$4 sm:$0xff]   ;;  %v699_v36 = vld [vmem:[#allocation5 + $0x1c0] ss:$16 sps:$4 sm:$0xff]   ;;  %v701_v37 = vld [vmem:[#allocation5 + $0x1a4] ss:$16 sps:$4 sm:$0xff]  }
  0x27   :  { %v712_v38 = vld [vmem:[#allocation5 + $0x1e8] ss:$16 sps:$4 sm:$0xff]   ;;  %v715_v39 = vld [vmem:[#allocation5 + $0x1cc] ss:$16 sps:$4 sm:$0xff]   ;;  %v44_v40 = vld [vmem:[#allocation2] sm:$0xff]  ;;  %v115_v4 = vshrl.u32 %v114_v3, 7 }
  0x28   :  { %461 = vmatpush1.bf16.msra.mxu0 %v663_v11  ;;  %v705_v41 = vld [vmem:[#allocation5 + $0x1a0] ss:$16 sps:$4 sm:$0xff]   ;;  %v47_v42 = vpack.c.bf16 %v44_v40, %v44_v40  ;;  %v707_v43 = vld [vmem:[#allocation5 + $0x184] ss:$16 sps:$4 sm:$0xff]   ;;  %v718_v44 = vld [vmem:[#allocation5 + $0x1c8] ss:$16 sps:$4 sm:$0xff]  }
  0x29   :  { %462 = vmatprep.subr.bf16.mxu0 %v665_v12  ;;  %502 = vmatpush1.bf16.msra.mxu1 %v682_v18  ;;  %v721_v45 = vld [vmem:[#allocation5 + $0x1ac] ss:$16 sps:$4 sm:$0xff]   ;;  %v711_v46 = vld [vmem:[#allocation5 + $0x180] ss:$16 sps:$4 sm:$0xff]   ;;  %v713_v47 = vld [vmem:[#allocation5 + $0x164] ss:$16 sps:$4 sm:$0xff]  }
  0x2a   :  { %503 = vmatprep.subr.bf16.mxu1 %v685_v19  ;;  %486 = vmatprep.mubr.bf16.mxu0 %v47_v42  ;;  %v724_v48 = vld [vmem:[#allocation5 + $0x1a8] ss:$16 sps:$4 sm:$0xff]   ;;  %v727_v49 = vld [vmem:[#allocation5 + $0x18c] ss:$16 sps:$4 sm:$0xff]   ;;  %v717_v50 = vld [vmem:[#allocation5 + $0x160] ss:$16 sps:$4 sm:$0xff]  }
  0x2b   :  { %527 = vmatprep.mubr.bf16.mxu1 %v47_v42  ;;  %v719_v51 = vld [vmem:[#allocation5 + $0x144] ss:$16 sps:$4 sm:$0xff]   ;;  %v730_v52 = vld [vmem:[#allocation5 + $0x188] ss:$16 sps:$4 sm:$0xff]   ;;  %v733_v53 = vld [vmem:[#allocation5 + $0x16c] ss:$16 sps:$4 sm:$0xff]  }
  0x2c   :  { %463 = vmatpush1.bf16.msra.mxu0 %v669_v16  ;;  %v723_v54 = vld [vmem:[#allocation5 + $0x140] ss:$16 sps:$4 sm:$0xff]   ;;  %v725_v55 = vld [vmem:[#allocation5 + $0x124] ss:$16 sps:$4 sm:$0xff]   ;;  %v736_v56 = vld [vmem:[#allocation5 + $0x168] ss:$16 sps:$4 sm:$0xff]  }
  0x2d   :  { %464 = vmatprep.subr.bf16.mxu0 %v671_v17  ;;  %504 = vmatpush1.bf16.msra.mxu1 %v688_v22  ;;  %v737_v57 = vld [vmem:[#allocation5 + $0x14c] ss:$16 sps:$4 sm:$0xff]   ;;  %v729_v58 = vld [vmem:[#allocation5 + $0x120] ss:$16 sps:$4 sm:$0xff]   ;;  %v731_v59 = vld [vmem:[#allocation5 + $0x104] ss:$16 sps:$4 sm:$0xff]  }
  0x2e   :  { %505 = vmatprep.subr.bf16.mxu1 %v691_v23  ;;  %v739_v60 = vld [vmem:[#allocation5 + $0x148] ss:$16 sps:$4 sm:$0xff]   ;;  %v740_v61 = vld [vmem:[#allocation5 + $0x12c] ss:$16 sps:$4 sm:$0xff]   ;;  %v735_v62 = vld [vmem:[#allocation5 + $0x100] ss:$16 sps:$4 sm:$0xff]  }
  0x2f   :  { %v742_v63 = vld [vmem:[#allocation5 + $0x128] ss:$16 sps:$4 sm:$0xff]   ;;  %v743_v0 = vld [vmem:[#allocation5 + $0x10c] ss:$16 sps:$4 sm:$0xff]   ;;  %v46_v1 = vld [vmem:[%s873_s0] sm:$0xf] }
  0x30   :  { %465 = vmatpush1.bf16.msra.mxu0 %v675_v20  ;;  %v745_v2 = vld [vmem:[#allocation5 + $0x108] ss:$16 sps:$4 sm:$0xff]   ;;  %v116_v5 = vsub.s32 0, %v115_v4  ;;  %v112_v6 = vld [vmem:[%s876_s3] sm:$0xf]  ;;  %v120_v7 = vsub.s32 1, %v115_v4 }
  0x31   :  { %466 = vmatprep.subr.bf16.mxu0 %v677_v21  ;;  %506 = vmatpush1.bf16.msra.mxu1 %v694_v26  ;;  %v128_v16 = vsub.s32 3, %v115_v4  ;;  %v124_v20 = vsub.s32 2, %v115_v4  ;;  %s832_s0 = smov [#allocation7]  }
  0x32   :  { %507 = vmatprep.subr.bf16.mxu1 %v697_v27  ;;  %v117_v8 = vrot.slane %v112_v6, %v116_v5  ;;  %v121_v9 = vrot.slane %v112_v6, %v120_v7  ;;  %s568_s3 = sshll.u32 %s832_s0, 4  ;;  %s569_s3 = int_to_ptr.vmem [resolvable:$true] %s568_s3 }
  0x33   :  { %v129_v22 = vrot.slane %v112_v6, %v128_v16  ;;  %s802_s29 = scalar_lea.vmem %s569_s3, 256  ;;  %p807_p11 = scmp.lt.s32.totalorder %s569_s3, %s569_s3 }
  0x34   :  { %467 = vmatpush1.bf16.msra.mxu0 %v681_v24  ;;  %v125_v24 = vrot.slane %v112_v6, %v124_v20  ;;  %p803_p10 = scmp.ne.s32.totalorder %s569_s3, %s802_s29  ;;  %p808_p12 = scmp.lt.s32.totalorder %s802_s29, %s802_s29 }
  0x35   :  { %468 = vmatprep.subr.bf16.mxu0 %v683_v25  ;;  %508 = vmatpush1.bf16.msra.mxu1 %v700_v30 }
  0x36   :  { %509 = vmatprep.subr.bf16.mxu1 %v703_v31  ;;  %p809_p13 = por %p808_p12, %p807_p11 }
  0x38   :  { %469 = vmatpush1.bf16.msra.mxu0 %v687_v28  ;;  %p810_p0 = pnand %p809_p13, %p803_p10 }
  0x39   :  { %470 = vmatprep.subr.bf16.mxu0 %v689_v29  ;;  %510 = vmatpush1.bf16.msra.mxu1 %v706_v34 }
  0x3a   :  { %511 = vmatprep.subr.bf16.mxu1 %v709_v35 }
  0x3c   :  { %471 = vmatpush2.bf16.msra.mxu0 %v693_v32 }
  0x3d   :  { %472 = vmatprep.subr.bf16.mxu0 %v695_v33  ;;  %512 = vmatpush2.bf16.msra.mxu1 %v712_v38 }
  0x3e   :  { %513 = vmatprep.subr.bf16.mxu1 %v715_v39 }
  0x40   :  { %473 = vmatpush2.bf16.msra.mxu0 %v699_v36  ;;  %v45_v36 = vld [vmem:[#allocation2 + $0x8] sm:$0xff] }
  0x41   :  { %474 = vmatprep.subr.bf16.mxu0 %v701_v37  ;;  %514 = vmatpush2.bf16.msra.mxu1 %v718_v44 }
  0x42   :  { %515 = vmatprep.subr.bf16.mxu1 %v721_v45 }
  0x44   :  { %475 = vmatpush2.bf16.msra.mxu0 %v705_v41 }
  0x45   :  { %476 = vmatprep.subr.bf16.mxu0 %v707_v43  ;;  %516 = vmatpush2.bf16.msra.mxu1 %v724_v48 }
  0x46   :  { %517 = vmatprep.subr.bf16.mxu1 %v727_v49 }
  0x48   :  { %477 = vmatpush2.bf16.msra.mxu0 %v711_v46 }
  0x49   :  { %478 = vmatprep.subr.bf16.mxu0 %v713_v47  ;;  %518 = vmatpush2.bf16.msra.mxu1 %v730_v52 }
  0x4a   :  { %519 = vmatprep.subr.bf16.mxu1 %v733_v53 }
  0x4c   :  { %479 = vmatpush2.bf16.msra.mxu0 %v717_v50 }
  0x4d   :  { %480 = vmatprep.subr.bf16.mxu0 %v719_v51  ;;  %520 = vmatpush2.bf16.msra.mxu1 %v736_v56 }
  0x4e   :  { %521 = vmatprep.subr.bf16.mxu1 %v737_v57 }
  0x50   :  { %481 = vmatpush2.bf16.msra.mxu0 %v723_v54 }
  0x51   :  { %482 = vmatprep.subr.bf16.mxu0 %v725_v55  ;;  %522 = vmatpush2.bf16.msra.mxu1 %v739_v60 }
  0x52   :  { %523 = vmatprep.subr.bf16.mxu1 %v740_v61 }
  0x54   :  { %483 = vmatpush2.bf16.msra.mxu0 %v729_v58 }
  0x55   :  { %484 = vmatprep.subr.bf16.mxu0 %v731_v59  ;;  %524 = vmatpush2.bf16.msra.mxu1 %v742_v63 }
  0x56   :  { %525 = vmatprep.subr.bf16.mxu1 %v743_v0 }
  0x58   :  { %485 = vmatpush2.bf16.msra.mxu0 %v735_v62 }
  0x59   :  { %526 = vmatpush2.bf16.msra.mxu1 %v745_v2 }
  0x5b   :  { %487 = vmatmul.mubr.bf16.vlgmr.msra.gmra.mxu0 %v46_v1 }
  0x5c   :  { %528 = vmatmul.mubr.bf16.vlgmr.msra.gmra.mxu1 %v46_v1 }
 0x11b   :  { %v488_v10 = vpop.f32.mrf.mxu0 }
 0x11c   :  { %v489_v11 = vadd.f32 %v488_v10, %v117_v8  ;;  %v529_v18 = vpop.f32.mrf.mxu1 }
 0x11d   :  { %v490_v12 = vpop.f32.mrf.mxu0  ;;  %v530_v27 = vadd.f32 %v529_v18, %v125_v24 }
 0x11e   :  { %v642_v13 = vmul.f32 -1.442695, %v489_v11  ;;  %v491_v14 = vadd.f32 %v490_v12, %v121_v9  ;;  %v531_v21 = vpop.f32.mrf.mxu1 }
 0x11f   :  { %v492_v15 = vpop.f32.mrf.mxu0  ;;  %v532_v26 = vadd.f32 %v531_v21, %v129_v22 }
 0x120   :  { %746 = vpow2.f32 %v642_v13  ;;  %v643_v17 = vmul.f32 -1.442695, %v491_v14  ;;  %v533_v23 = vpop.f32.mrf.mxu1 }
 0x121   :  { %v493_v19 = vpop.f32.mrf.mxu0  ;;  %v644_v28 = vmul.f32 -1.442695, %v532_v26 }
 0x122   :  { %748 = vpow2.f32 %v643_v17  ;;  %v534_v25 = vpop.f32.mrf.mxu1 }
 0x123   :  { %750 = vtanh.f32 %v530_v27 }
 0x124   :  { %752 = vpow2.f32 %v644_v28 }
 0x12d   :  { %v747_v29 = vpop.eup %746 }
 0x12e   :  { %v539_v30 = vadd.f32 1.0, %v747_v29 }
 0x12f   :  { %v749_v31 = vpop.eup %748 }
 0x130   :  { %754 = vrcp.f32 %v539_v30  ;;  %v545_v32 = vadd.f32 1.0, %v749_v31  ;;  %v751_v33 = vpop.eup %750 }
 0x131   :  { %v753_v34 = vpop.eup %752 }
 0x132   :  { %756 = vrcp.f32 %v545_v32  ;;  %v552_v38 = vadd.f32 1.0, %v753_v34 }
 0x134   :  { %758 = vrcp.f32 %v552_v38 }
 0x13d   :  { %v755_v35 = vpop.eup %754 }
 0x13e   :  { %v556_v40 = vmul.f32 %v755_v35, %v751_v33 }
 0x13f   :  { %v757_v37 = vpop.eup %756 }
 0x140   :  { %v555_v39 = vmul.f32 %v757_v37, %v45_v36 }
 0x141   :  { %v759_v42 = vpop.eup %758 }
 0x142   :  { %v557_v41 = vadd.f32 %v556_v40, %v555_v39 }
 0x144   :  { %760 = vtanh.f32 %v557_v41  ;;  %561 = vst [vmem:[#allocation7 + $0x8] sm:$0xff] %v557_v41 }
 0x151   :  { %v761_v43 = vpop.eup %760 }
 0x152   :  { %v559_v44 = vmul.f32 %v761_v43, %v759_v42 }
 0x154   :  { %560 = vst [vmem:[#allocation7] sm:$0xff] %v559_v44 }
 0x155   :  { %813 = shalt.err (!%p810_p0)
}
 0x156   :  { %571 = dma.vmem_to_hbm [thread:$0]  %s569_s3, 256, %s877_s4, [#allocation4]  }
 0x157   :  { %826 = dma.done.wait [#allocation4], 256  }
 0x158   :  { %827 = vsyncadd [#allocation4], 4294967040 }
 0x159   :  { %575 = vsyncpa [#allocation3], 1 }
 0x15a   :  { %576 = vsyncpa [#allocation6], 1 }
 0x15b   :  { %577 = vsyncpa [#allocation4], 1 }

</bundles_post_ra>
